<compile_context>
chip_gen: v6e
topology: v6e:2x2x1
jax: 0.10.0
libtpu: 0.0.40
codegen_flags: <defaults>
</compile_context>

<pallas_src>
import jax
import jax.numpy as jnp
import numpy as np
from jax.experimental import pallas as pl
from jax.experimental.pallas import tpu as pltpu


def _ceil_to(x, m):
    return ((x + m - 1) // m) * m


def _vsn_kernel(x_ref, wih_ref, bx_ref, whh_ref, bn_ref, wp_ref, bp_ref,
                out_ref, gx_ref):
    # x_ref:   (T*Bp, E)  time-major, batch-padded, flattened
    # wih_ref: (E, GP)    packed [w_ir | w_iz | w_in] at lane offsets 0,H,2H
    # bx_ref:  (1, GP)    packed [b_ir+b_hr | b_iz+b_hz | b_in]
    # whh_ref: (H, GP)    packed [w_hr | w_hz | w_hn]
    # bn_ref:  (1, H)     b_hn  (must stay inside r*( . ))
    # wp_ref:  (H, Vp), bp_ref: (1, Vp) with -1e30 in padded logit lanes
    # out_ref: (Bp, Vp)
    # gx_ref:  (T*Bp, GP) VMEM scratch for the hoisted input projection
    TB, E = x_ref.shape
    H, GP = whh_ref.shape
    Bp = out_ref.shape[0]
    T = TB // Bp

    # Hoisted input projection: all timesteps in one GEMM, staged in VMEM
    # scratch so the unrolled recurrence reloads aligned (Bp, GP) slices.
    gx_ref[...] = jnp.dot(x_ref[...], wih_ref[...],
                          preferred_element_type=jnp.float32) + bx_ref[...]

    w_hh = whh_ref[...]
    b_n = bn_ref[...]                       # (1, H) — only the n-gate bias

    h = jnp.zeros((Bp, H), jnp.float32)
    # Fully unrolled recurrence (T small & static): one single-tile MXU push
    # per step, EUP sigmoid/tanh overlapped with the next step by the LLO
    # scheduler.
    for t in range(T):
        g_x = gx_ref[t * Bp:(t + 1) * Bp, :]                    # (Bp, GP)
        g_h = jnp.dot(h, w_hh, preferred_element_type=jnp.float32)
        r = jax.nn.sigmoid(g_x[:, 0 * H:1 * H] + g_h[:, 0 * H:1 * H])
        z = jax.nn.sigmoid(g_x[:, 1 * H:2 * H] + g_h[:, 1 * H:2 * H])
        n = jnp.tanh(g_x[:, 2 * H:3 * H] + r * (g_h[:, 2 * H:3 * H] + b_n))
        h = (1.0 - z) * n + z * h

    # Linear projection of the last GRU output + masked, lane-dense softmax.
    logits = jnp.dot(h, wp_ref[...], preferred_element_type=jnp.float32) + bp_ref[...]
    m = jnp.max(logits, axis=-1, keepdims=True)
    e = jnp.exp(logits - m)                 # padded lanes: exp(-1e30 - m) == 0
    s = jnp.sum(e, axis=-1, keepdims=True)
    out_ref[...] = e * pl.reciprocal(s, approx=True)


def _pack_params(params, GP, Vp):
    """Fuse/pad weights & biases into packed, lane-aligned kernel operands."""
    w_ih, w_hh = params["w_ih"], params["w_hh"]          # (3,E,H), (3,H,H)
    b_ih, b_hh = params["b_ih"], params["b_hh"]          # (3,1,H)
    w_proj, b_proj = params["w_proj"], params["b_proj"]  # (H,V), (1,V)
    V = w_proj.shape[1]

    pad_g = lambda a: jnp.pad(a, ((0, 0), (0, GP - a.shape[1])))  # 3H -> GP

    w_ih_f = pad_g(jnp.concatenate([w_ih[0], w_ih[1], w_ih[2]], axis=1))  # (E, GP)
    w_hh_f = pad_g(jnp.concatenate([w_hh[0], w_hh[1], w_hh[2]], axis=1))  # (H, GP)
    # r/z hidden biases fold into the x-projection bias; b_hn stays separate
    # because it must sit inside r * ( . ) in the GRU formula.
    b_x = pad_g(jnp.concatenate([b_ih[0] + b_hh[0],
                                 b_ih[1] + b_hh[1],
                                 b_ih[2]], axis=1))                       # (1, GP)
    b_n = b_hh[2]                                                         # (1, H)

    w_p = jnp.pad(w_proj, ((0, 0), (0, Vp - V)))
    b_p = jnp.pad(b_proj, ((0, 0), (0, Vp - V)), constant_values=-1e30)
    return w_ih_f, b_x, w_hh_f, b_n, w_p, b_p


def vsn_forward(x_btE, params):
    """x_btE: (B, T, E) float32 -> (B, 1, V) softmax weights (PyTorch semantics)."""
    B, T, E = x_btE.shape
    H = params["w_hh"].shape[1]
    V = params["w_proj"].shape[1]
    Bp = _ceil_to(B, 8)          # sublane multiple
    GP = _ceil_to(3 * H, 128)    # packed gate block, lane multiple
    Vp = _ceil_to(V, 128)        # lane-dense output store

    w_ih_f, b_x, w_hh_f, b_n, w_p, b_p = _pack_params(params, GP, Vp)

    # Time-major, batch-padded, flattened x (the tiny transpose/pad is fused
    # by XLA); gx is produced & consumed inside the kernel (no HBM round-trip
    # of the large intermediate).
    x_p = jnp.pad(jnp.transpose(x_btE, (1, 0, 2)),
                  ((0, 0), (0, Bp - B), (0, 0))).reshape(T * Bp, E)

    vmem = pl.BlockSpec(memory_space=pltpu.MemorySpace.VMEM)
    out = pl.pallas_call(
        _vsn_kernel,
        out_shape=jax.ShapeDtypeStruct((Bp, Vp), jnp.float32),
        in_specs=[vmem] * 7,
        out_specs=vmem,
        scratch_shapes=[pltpu.VMEM((T * Bp, GP), jnp.float32)],
    )(x_p, w_ih_f, b_x, w_hh_f, b_n, w_p, b_p)
    return out[:B, :V][:, None, :]   # (B, 1, V)


def make_params(key, cov_emb, n_vars):
    """Deterministic synthetic params matching nn.GRU(E,E) + nn.Linear(E, V)."""
    H = cov_emb
    ks = jax.random.split(key, 6)
    s = 1.0 / np.sqrt(H)
    u = lambda k, shape: jax.random.uniform(k, shape, jnp.float32, -s, s)
    return dict(
        w_ih=u(ks[0], (3, cov_emb, H)),   # (gate, E, H) == torch weight_ih_l0.T per gate
        w_hh=u(ks[1], (3, H, H)),
        b_ih=u(ks[2], (3, 1, H)),
        b_hh=u(ks[3], (3, 1, H)),
        w_proj=u(ks[4], (H, n_vars)),
        b_proj=u(ks[5], (1, n_vars)),
    )


def vsn_reference(x_btE, params):
    """Pure-JAX reference reproducing torch.nn.GRU + Linear + softmax semantics."""
    B, T, E = x_btE.shape
    w_ih, w_hh, b_ih, b_hh = (params["w_ih"], params["w_hh"],
                              params["b_ih"], params["b_hh"])
    h = jnp.zeros((B, E), jnp.float32)
    for t in range(T):
        xt = x_btE[:, t, :]
        r = jax.nn.sigmoid(xt @ w_ih[0] + b_ih[0] + h @ w_hh[0] + b_hh[0])
        z = jax.nn.sigmoid(xt @ w_ih[1] + b_ih[1] + h @ w_hh[1] + b_hh[1])
        n = jnp.tanh(xt @ w_ih[2] + b_ih[2] + r * (h @ w_hh[2] + b_hh[2]))
        h = (1.0 - z) * n + z * h
    logits = h @ params["w_proj"] + params["b_proj"]
    return jax.nn.softmax(logits, axis=-1)[:, None, :]


if __name__ == "__main__":
    B, T, cov_emb, n_vars = 2, 8, 32, 4

    key = jax.random.PRNGKey(0)
    kx, kp = jax.random.split(key)
    x = jax.random.normal(kx, (B, T, cov_emb), jnp.float32)
    params = make_params(kp, cov_emb, n_vars)

    out = jax.jit(vsn_forward)(x, params)
    out = jax.block_until_ready(out)

    ref = vsn_reference(x, params)
    assert out.shape == (B, 1, n_vars)
    # Tolerance accounts for the approximate EUP reciprocal in the softmax
    # (rows sum to 1 only to ~2^-12); all matmuls / gate math remain f32.
    np.testing.assert_allclose(np.asarray(out), np.asarray(ref),
                               rtol=1e-3, atol=1e-3)
    print("KERNEL_OK")
</pallas_src>

<mosaic_0001>
module attributes {stable_mosaic.version = 11 : i64} {
  func.func @_vsn_kernel(%arg0: memref<64x32xf32, #tpu.memory_space<vmem>>, %arg1: memref<32x128xf32, #tpu.memory_space<vmem>>, %arg2: memref<1x128xf32, #tpu.memory_space<vmem>>, %arg3: memref<32x128xf32, #tpu.memory_space<vmem>>, %arg4: memref<1x32xf32, #tpu.memory_space<vmem>>, %arg5: memref<32x128xf32, #tpu.memory_space<vmem>>, %arg6: memref<1x128xf32, #tpu.memory_space<vmem>>, %arg7: memref<8x128xf32, #tpu.memory_space<vmem>>, %arg8: memref<64x128xf32, #tpu.memory_space<vmem>>) attributes {dimension_semantics = [], scalar_prefetch = 0 : i64, scratch_operands = 1 : i64, tpu.core_type = #tpu.core_type<tc>} {
    %c0 = arith.constant 0 : index
    %c0_0 = arith.constant 0 : index
    %0 = vector.load %arg0[%c0, %c0_0] : memref<64x32xf32, #tpu.memory_space<vmem>>, vector<64x32xf32>
    %c0_1 = arith.constant 0 : index
    %c0_2 = arith.constant 0 : index
    %1 = vector.load %arg1[%c0_1, %c0_2] : memref<32x128xf32, #tpu.memory_space<vmem>>, vector<32x128xf32>
    %cst = arith.constant dense<0.000000e+00> : vector<64x128xf32>
    %2 = tpu.matmul %0, %1, %cst {dimension_numbers = #tpu.dot_dimension_numbers<[1], [0], [0], [1], [0, 0, 1, 1], [], []>} : vector<64x32xf32>, vector<32x128xf32>, vector<64x128xf32> -> vector<64x128xf32>
    %c0_3 = arith.constant 0 : index
    %c0_4 = arith.constant 0 : index
    %3 = vector.load %arg2[%c0_3, %c0_4] : memref<1x128xf32, #tpu.memory_space<vmem>>, vector<1x128xf32>
    %4 = vector.broadcast %3 : vector<1x128xf32> to vector<64x128xf32>
    %5 = arith.addf %2, %4 : vector<64x128xf32>
    %c0_5 = arith.constant 0 : index
    %c0_6 = arith.constant 0 : index
    %6 = vector.load %arg8[%c0_5, %c0_6] : memref<64x128xf32, #tpu.memory_space<vmem>>, vector<64x128xf32>
    tpu.vector_store %arg8[%c0_5, %c0_6], %5 {strides = array<i32>} : memref<64x128xf32, #tpu.memory_space<vmem>>, vector<64x128xf32>,
    %c0_7 = arith.constant 0 : index
    %c0_8 = arith.constant 0 : index
    %7 = vector.load %arg3[%c0_7, %c0_8] : memref<32x128xf32, #tpu.memory_space<vmem>>, vector<32x128xf32>
    %c0_9 = arith.constant 0 : index
    %c0_10 = arith.constant 0 : index
    %8 = vector.load %arg4[%c0_9, %c0_10] : memref<1x32xf32, #tpu.memory_space<vmem>>, vector<1x32xf32>
    %cst_11 = arith.constant 0.000000e+00 : f32
    %9 = vector.broadcast %cst_11 : f32 to vector<8x32xf32>
    %c0_12 = arith.constant 0 : index
    %c0_13 = arith.constant 0 : index
    %10 = vector.load %arg8[%c0_12, %c0_13] : memref<64x128xf32, #tpu.memory_space<vmem>>, vector<8x128xf32>
    %cst_14 = arith.constant dense<0.000000e+00> : vector<8x128xf32>
    %11 = tpu.matmul %9, %7, %cst_14 {dimension_numbers = #tpu.dot_dimension_numbers<[1], [0], [0], [1], [0, 0, 1, 1], [], []>} : vector<8x32xf32>, vector<32x128xf32>, vector<8x128xf32> -> vector<8x128xf32>
    %12 = vector.extract_strided_slice %10 {offsets = [0, 0], sizes = [8, 32], strides = [1, 1]} : vector<8x128xf32> to vector<8x32xf32>
    %13 = vector.extract_strided_slice %11 {offsets = [0, 0], sizes = [8, 32], strides = [1, 1]} : vector<8x128xf32> to vector<8x32xf32>
    %14 = arith.addf %12, %13 : vector<8x32xf32>
    %15 = arith.negf %14 : vector<8x32xf32>
    %16 = math.exp %15 : vector<8x32xf32>
    %cst_15 = arith.constant 1.000000e+00 : f32
    %17 = vector.broadcast %cst_15 : f32 to vector<8x32xf32>
    %18 = arith.addf %17, %16 : vector<8x32xf32>
    %19 = arith.divf %17, %18 : vector<8x32xf32>
    %20 = vector.extract_strided_slice %10 {offsets = [0, 32], sizes = [8, 32], strides = [1, 1]} : vector<8x128xf32> to vector<8x32xf32>
    %21 = vector.extract_strided_slice %11 {offsets = [0, 32], sizes = [8, 32], strides = [1, 1]} : vector<8x128xf32> to vector<8x32xf32>
    %22 = arith.addf %20, %21 : vector<8x32xf32>
    %23 = arith.negf %22 : vector<8x32xf32>
    %24 = math.exp %23 : vector<8x32xf32>
    %cst_16 = arith.constant 1.000000e+00 : f32
    %25 = vector.broadcast %cst_16 : f32 to vector<8x32xf32>
    %26 = arith.addf %25, %24 : vector<8x32xf32>
    %27 = arith.divf %25, %26 : vector<8x32xf32>
    %28 = vector.extract_strided_slice %10 {offsets = [0, 64], sizes = [8, 32], strides = [1, 1]} : vector<8x128xf32> to vector<8x32xf32>
    %29 = vector.extract_strided_slice %11 {offsets = [0, 64], sizes = [8, 32], strides = [1, 1]} : vector<8x128xf32> to vector<8x32xf32>
    %30 = vector.broadcast %8 : vector<1x32xf32> to vector<8x32xf32>
    %31 = arith.addf %29, %30 : vector<8x32xf32>
    %32 = arith.mulf %19, %31 : vector<8x32xf32>
    %33 = arith.addf %28, %32 : vector<8x32xf32>
    %34 = math.tanh %33 : vector<8x32xf32>
    %cst_17 = arith.constant 1.000000e+00 : f32
    %35 = vector.broadcast %cst_17 : f32 to vector<8x32xf32>
    %36 = arith.subf %35, %27 : vector<8x32xf32>
    %37 = arith.mulf %36, %34 : vector<8x32xf32>
    %38 = arith.mulf %27, %9 : vector<8x32xf32>
    %39 = arith.addf %37, %38 : vector<8x32xf32>
    %c8 = arith.constant 8 : index
    %c0_18 = arith.constant 0 : index
    %40 = vector.load %arg8[%c8, %c0_18] : memref<64x128xf32, #tpu.memory_space<vmem>>, vector<8x128xf32>
    %cst_19 = arith.constant dense<0.000000e+00> : vector<8x128xf32>
    %41 = tpu.matmul %39, %7, %cst_19 {dimension_numbers = #tpu.dot_dimension_numbers<[1], [0], [0], [1], [0, 0, 1, 1], [], []>} : vector<8x32xf32>, vector<32x128xf32>, vector<8x128xf32> -> vector<8x128xf32>
    %42 = vector.extract_strided_slice %40 {offsets = [0, 0], sizes = [8, 32], strides = [1, 1]} : vector<8x128xf32> to vector<8x32xf32>
    %43 = vector.extract_strided_slice %41 {offsets = [0, 0], sizes = [8, 32], strides = [1, 1]} : vector<8x128xf32> to vector<8x32xf32>
    %44 = arith.addf %42, %43 : vector<8x32xf32>
    %45 = arith.negf %44 : vector<8x32xf32>
    %46 = math.exp %45 : vector<8x32xf32>
    %cst_20 = arith.constant 1.000000e+00 : f32
    %47 = vector.broadcast %cst_20 : f32 to vector<8x32xf32>
    %48 = arith.addf %47, %46 : vector<8x32xf32>
    %49 = arith.divf %47, %48 : vector<8x32xf32>
    %50 = vector.extract_strided_slice %40 {offsets = [0, 32], sizes = [8, 32], strides = [1, 1]} : vector<8x128xf32> to vector<8x32xf32>
    %51 = vector.extract_strided_slice %41 {offsets = [0, 32], sizes = [8, 32], strides = [1, 1]} : vector<8x128xf32> to vector<8x32xf32>
    %52 = arith.addf %50, %51 : vector<8x32xf32>
    %53 = arith.negf %52 : vector<8x32xf32>
    %54 = math.exp %53 : vector<8x32xf32>
    %cst_21 = arith.constant 1.000000e+00 : f32
    %55 = vector.broadcast %cst_21 : f32 to vector<8x32xf32>
    %56 = arith.addf %55, %54 : vector<8x32xf32>
    %57 = arith.divf %55, %56 : vector<8x32xf32>
    %58 = vector.extract_strided_slice %40 {offsets = [0, 64], sizes = [8, 32], strides = [1, 1]} : vector<8x128xf32> to vector<8x32xf32>
    %59 = vector.extract_strided_slice %41 {offsets = [0, 64], sizes = [8, 32], strides = [1, 1]} : vector<8x128xf32> to vector<8x32xf32>
    %60 = vector.broadcast %8 : vector<1x32xf32> to vector<8x32xf32>
    %61 = arith.addf %59, %60 : vector<8x32xf32>
    %62 = arith.mulf %49, %61 : vector<8x32xf32>
    %63 = arith.addf %58, %62 : vector<8x32xf32>
    %64 = math.tanh %63 : vector<8x32xf32>
    %cst_22 = arith.constant 1.000000e+00 : f32
    %65 = vector.broadcast %cst_22 : f32 to vector<8x32xf32>
    %66 = arith.subf %65, %57 : vector<8x32xf32>
    %67 = arith.mulf %66, %64 : vector<8x32xf32>
    %68 = arith.mulf %57, %39 : vector<8x32xf32>
    %69 = arith.addf %67, %68 : vector<8x32xf32>
    %c16 = arith.constant 16 : index
    %c0_23 = arith.constant 0 : index
    %70 = vector.load %arg8[%c16, %c0_23] : memref<64x128xf32, #tpu.memory_space<vmem>>, vector<8x128xf32>
    %cst_24 = arith.constant dense<0.000000e+00> : vector<8x128xf32>
    %71 = tpu.matmul %69, %7, %cst_24 {dimension_numbers = #tpu.dot_dimension_numbers<[1], [0], [0], [1], [0, 0, 1, 1], [], []>} : vector<8x32xf32>, vector<32x128xf32>, vector<8x128xf32> -> vector<8x128xf32>
    %72 = vector.extract_strided_slice %70 {offsets = [0, 0], sizes = [8, 32], strides = [1, 1]} : vector<8x128xf32> to vector<8x32xf32>
    %73 = vector.extract_strided_slice %71 {offsets = [0, 0], sizes = [8, 32], strides = [1, 1]} : vector<8x128xf32> to vector<8x32xf32>
    %74 = arith.addf %72, %73 : vector<8x32xf32>
    %75 = arith.negf %74 : vector<8x32xf32>
    %76 = math.exp %75 : vector<8x32xf32>
    %cst_25 = arith.constant 1.000000e+00 : f32
    %77 = vector.broadcast %cst_25 : f32 to vector<8x32xf32>
    %78 = arith.addf %77, %76 : vector<8x32xf32>
    %79 = arith.divf %77, %78 : vector<8x32xf32>
    %80 = vector.extract_strided_slice %70 {offsets = [0, 32], sizes = [8, 32], strides = [1, 1]} : vector<8x128xf32> to vector<8x32xf32>
    %81 = vector.extract_strided_slice %71 {offsets = [0, 32], sizes = [8, 32], strides = [1, 1]} : vector<8x128xf32> to vector<8x32xf32>
    %82 = arith.addf %80, %81 : vector<8x32xf32>
    %83 = arith.negf %82 : vector<8x32xf32>
    %84 = math.exp %83 : vector<8x32xf32>
    %cst_26 = arith.constant 1.000000e+00 : f32
    %85 = vector.broadcast %cst_26 : f32 to vector<8x32xf32>
    %86 = arith.addf %85, %84 : vector<8x32xf32>
    %87 = arith.divf %85, %86 : vector<8x32xf32>
    %88 = vector.extract_strided_slice %70 {offsets = [0, 64], sizes = [8, 32], strides = [1, 1]} : vector<8x128xf32> to vector<8x32xf32>
    %89 = vector.extract_strided_slice %71 {offsets = [0, 64], sizes = [8, 32], strides = [1, 1]} : vector<8x128xf32> to vector<8x32xf32>
    %90 = vector.broadcast %8 : vector<1x32xf32> to vector<8x32xf32>
    %91 = arith.addf %89, %90 : vector<8x32xf32>
    %92 = arith.mulf %79, %91 : vector<8x32xf32>
    %93 = arith.addf %88, %92 : vector<8x32xf32>
    %94 = math.tanh %93 : vector<8x32xf32>
    %cst_27 = arith.constant 1.000000e+00 : f32
    %95 = vector.broadcast %cst_27 : f32 to vector<8x32xf32>
    %96 = arith.subf %95, %87 : vector<8x32xf32>
    %97 = arith.mulf %96, %94 : vector<8x32xf32>
    %98 = arith.mulf %87, %69 : vector<8x32xf32>
    %99 = arith.addf %97, %98 : vector<8x32xf32>
    %c24 = arith.constant 24 : index
    %c0_28 = arith.constant 0 : index
    %100 = vector.load %arg8[%c24, %c0_28] : memref<64x128xf32, #tpu.memory_space<vmem>>, vector<8x128xf32>
    %cst_29 = arith.constant dense<0.000000e+00> : vector<8x128xf32>
    %101 = tpu.matmul %99, %7, %cst_29 {dimension_numbers = #tpu.dot_dimension_numbers<[1], [0], [0], [1], [0, 0, 1, 1], [], []>} : vector<8x32xf32>, vector<32x128xf32>, vector<8x128xf32> -> vector<8x128xf32>
    %102 = vector.extract_strided_slice %100 {offsets = [0, 0], sizes = [8, 32], strides = [1, 1]} : vector<8x128xf32> to vector<8x32xf32>
    %103 = vector.extract_strided_slice %101 {offsets = [0, 0], sizes = [8, 32], strides = [1, 1]} : vector<8x128xf32> to vector<8x32xf32>
    %104 = arith.addf %102, %103 : vector<8x32xf32>
    %105 = arith.negf %104 : vector<8x32xf32>
    %106 = math.exp %105 : vector<8x32xf32>
    %cst_30 = arith.constant 1.000000e+00 : f32
    %107 = vector.broadcast %cst_30 : f32 to vector<8x32xf32>
    %108 = arith.addf %107, %106 : vector<8x32xf32>
    %109 = arith.divf %107, %108 : vector<8x32xf32>
    %110 = vector.extract_strided_slice %100 {offsets = [0, 32], sizes = [8, 32], strides = [1, 1]} : vector<8x128xf32> to vector<8x32xf32>
    %111 = vector.extract_strided_slice %101 {offsets = [0, 32], sizes = [8, 32], strides = [1, 1]} : vector<8x128xf32> to vector<8x32xf32>
    %112 = arith.addf %110, %111 : vector<8x32xf32>
    %113 = arith.negf %112 : vector<8x32xf32>
    %114 = math.exp %113 : vector<8x32xf32>
    %cst_31 = arith.constant 1.000000e+00 : f32
    %115 = vector.broadcast %cst_31 : f32 to vector<8x32xf32>
    %116 = arith.addf %115, %114 : vector<8x32xf32>
    %117 = arith.divf %115, %116 : vector<8x32xf32>
    %118 = vector.extract_strided_slice %100 {offsets = [0, 64], sizes = [8, 32], strides = [1, 1]} : vector<8x128xf32> to vector<8x32xf32>
    %119 = vector.extract_strided_slice %101 {offsets = [0, 64], sizes = [8, 32], strides = [1, 1]} : vector<8x128xf32> to vector<8x32xf32>
    %120 = vector.broadcast %8 : vector<1x32xf32> to vector<8x32xf32>
    %121 = arith.addf %119, %120 : vector<8x32xf32>
    %122 = arith.mulf %109, %121 : vector<8x32xf32>
    %123 = arith.addf %118, %122 : vector<8x32xf32>
    %124 = math.tanh %123 : vector<8x32xf32>
    %cst_32 = arith.constant 1.000000e+00 : f32
    %125 = vector.broadcast %cst_32 : f32 to vector<8x32xf32>
    %126 = arith.subf %125, %117 : vector<8x32xf32>
    %127 = arith.mulf %126, %124 : vector<8x32xf32>
    %128 = arith.mulf %117, %99 : vector<8x32xf32>
    %129 = arith.addf %127, %128 : vector<8x32xf32>
    %c32 = arith.constant 32 : index
    %c0_33 = arith.constant 0 : index
    %130 = vector.load %arg8[%c32, %c0_33] : memref<64x128xf32, #tpu.memory_space<vmem>>, vector<8x128xf32>
    %cst_34 = arith.constant dense<0.000000e+00> : vector<8x128xf32>
    %131 = tpu.matmul %129, %7, %cst_34 {dimension_numbers = #tpu.dot_dimension_numbers<[1], [0], [0], [1], [0, 0, 1, 1], [], []>} : vector<8x32xf32>, vector<32x128xf32>, vector<8x128xf32> -> vector<8x128xf32>
    %132 = vector.extract_strided_slice %130 {offsets = [0, 0], sizes = [8, 32], strides = [1, 1]} : vector<8x128xf32> to vector<8x32xf32>
    %133 = vector.extract_strided_slice %131 {offsets = [0, 0], sizes = [8, 32], strides = [1, 1]} : vector<8x128xf32> to vector<8x32xf32>
    %134 = arith.addf %132, %133 : vector<8x32xf32>
    %135 = arith.negf %134 : vector<8x32xf32>
    %136 = math.exp %135 : vector<8x32xf32>
    %cst_35 = arith.constant 1.000000e+00 : f32
    %137 = vector.broadcast %cst_35 : f32 to vector<8x32xf32>
    %138 = arith.addf %137, %136 : vector<8x32xf32>
    %139 = arith.divf %137, %138 : vector<8x32xf32>
    %140 = vector.extract_strided_slice %130 {offsets = [0, 32], sizes = [8, 32], strides = [1, 1]} : vector<8x128xf32> to vector<8x32xf32>
    %141 = vector.extract_strided_slice %131 {offsets = [0, 32], sizes = [8, 32], strides = [1, 1]} : vector<8x128xf32> to vector<8x32xf32>
    %142 = arith.addf %140, %141 : vector<8x32xf32>
    %143 = arith.negf %142 : vector<8x32xf32>
    %144 = math.exp %143 : vector<8x32xf32>
    %cst_36 = arith.constant 1.000000e+00 : f32
    %145 = vector.broadcast %cst_36 : f32 to vector<8x32xf32>
    %146 = arith.addf %145, %144 : vector<8x32xf32>
    %147 = arith.divf %145, %146 : vector<8x32xf32>
    %148 = vector.extract_strided_slice %130 {offsets = [0, 64], sizes = [8, 32], strides = [1, 1]} : vector<8x128xf32> to vector<8x32xf32>
    %149 = vector.extract_strided_slice %131 {offsets = [0, 64], sizes = [8, 32], strides = [1, 1]} : vector<8x128xf32> to vector<8x32xf32>
    %150 = vector.broadcast %8 : vector<1x32xf32> to vector<8x32xf32>
    %151 = arith.addf %149, %150 : vector<8x32xf32>
    %152 = arith.mulf %139, %151 : vector<8x32xf32>
    %153 = arith.addf %148, %152 : vector<8x32xf32>
    %154 = math.tanh %153 : vector<8x32xf32>
    %cst_37 = arith.constant 1.000000e+00 : f32
    %155 = vector.broadcast %cst_37 : f32 to vector<8x32xf32>
    %156 = arith.subf %155, %147 : vector<8x32xf32>
    %157 = arith.mulf %156, %154 : vector<8x32xf32>
    %158 = arith.mulf %147, %129 : vector<8x32xf32>
    %159 = arith.addf %157, %158 : vector<8x32xf32>
    %c40 = arith.constant 40 : index
    %c0_38 = arith.constant 0 : index
    %160 = vector.load %arg8[%c40, %c0_38] : memref<64x128xf32, #tpu.memory_space<vmem>>, vector<8x128xf32>
    %cst_39 = arith.constant dense<0.000000e+00> : vector<8x128xf32>
    %161 = tpu.matmul %159, %7, %cst_39 {dimension_numbers = #tpu.dot_dimension_numbers<[1], [0], [0], [1], [0, 0, 1, 1], [], []>} : vector<8x32xf32>, vector<32x128xf32>, vector<8x128xf32> -> vector<8x128xf32>
    %162 = vector.extract_strided_slice %160 {offsets = [0, 0], sizes = [8, 32], strides = [1, 1]} : vector<8x128xf32> to vector<8x32xf32>
    %163 = vector.extract_strided_slice %161 {offsets = [0, 0], sizes = [8, 32], strides = [1, 1]} : vector<8x128xf32> to vector<8x32xf32>
    %164 = arith.addf %162, %163 : vector<8x32xf32>
    %165 = arith.negf %164 : vector<8x32xf32>
    %166 = math.exp %165 : vector<8x32xf32>
    %cst_40 = arith.constant 1.000000e+00 : f32
    %167 = vector.broadcast %cst_40 : f32 to vector<8x32xf32>
    %168 = arith.addf %167, %166 : vector<8x32xf32>
    %169 = arith.divf %167, %168 : vector<8x32xf32>
    %170 = vector.extract_strided_slice %160 {offsets = [0, 32], sizes = [8, 32], strides = [1, 1]} : vector<8x128xf32> to vector<8x32xf32>
    %171 = vector.extract_strided_slice %161 {offsets = [0, 32], sizes = [8, 32], strides = [1, 1]} : vector<8x128xf32> to vector<8x32xf32>
    %172 = arith.addf %170, %171 : vector<8x32xf32>
    %173 = arith.negf %172 : vector<8x32xf32>
    %174 = math.exp %173 : vector<8x32xf32>
    %cst_41 = arith.constant 1.000000e+00 : f32
    %175 = vector.broadcast %cst_41 : f32 to vector<8x32xf32>
    %176 = arith.addf %175, %174 : vector<8x32xf32>
    %177 = arith.divf %175, %176 : vector<8x32xf32>
    %178 = vector.extract_strided_slice %160 {offsets = [0, 64], sizes = [8, 32], strides = [1, 1]} : vector<8x128xf32> to vector<8x32xf32>
    %179 = vector.extract_strided_slice %161 {offsets = [0, 64], sizes = [8, 32], strides = [1, 1]} : vector<8x128xf32> to vector<8x32xf32>
    %180 = vector.broadcast %8 : vector<1x32xf32> to vector<8x32xf32>
    %181 = arith.addf %179, %180 : vector<8x32xf32>
    %182 = arith.mulf %169, %181 : vector<8x32xf32>
    %183 = arith.addf %178, %182 : vector<8x32xf32>
    %184 = math.tanh %183 : vector<8x32xf32>
    %cst_42 = arith.constant 1.000000e+00 : f32
    %185 = vector.broadcast %cst_42 : f32 to vector<8x32xf32>
    %186 = arith.subf %185, %177 : vector<8x32xf32>
    %187 = arith.mulf %186, %184 : vector<8x32xf32>
    %188 = arith.mulf %177, %159 : vector<8x32xf32>
    %189 = arith.addf %187, %188 : vector<8x32xf32>
    %c48 = arith.constant 48 : index
    %c0_43 = arith.constant 0 : index
    %190 = vector.load %arg8[%c48, %c0_43] : memref<64x128xf32, #tpu.memory_space<vmem>>, vector<8x128xf32>
    %cst_44 = arith.constant dense<0.000000e+00> : vector<8x128xf32>
    %191 = tpu.matmul %189, %7, %cst_44 {dimension_numbers = #tpu.dot_dimension_numbers<[1], [0], [0], [1], [0, 0, 1, 1], [], []>} : vector<8x32xf32>, vector<32x128xf32>, vector<8x128xf32> -> vector<8x128xf32>
    %192 = vector.extract_strided_slice %190 {offsets = [0, 0], sizes = [8, 32], strides = [1, 1]} : vector<8x128xf32> to vector<8x32xf32>
    %193 = vector.extract_strided_slice %191 {offsets = [0, 0], sizes = [8, 32], strides = [1, 1]} : vector<8x128xf32> to vector<8x32xf32>
    %194 = arith.addf %192, %193 : vector<8x32xf32>
    %195 = arith.negf %194 : vector<8x32xf32>
    %196 = math.exp %195 : vector<8x32xf32>
    %cst_45 = arith.constant 1.000000e+00 : f32
    %197 = vector.broadcast %cst_45 : f32 to vector<8x32xf32>
    %198 = arith.addf %197, %196 : vector<8x32xf32>
    %199 = arith.divf %197, %198 : vector<8x32xf32>
    %200 = vector.extract_strided_slice %190 {offsets = [0, 32], sizes = [8, 32], strides = [1, 1]} : vector<8x128xf32> to vector<8x32xf32>
    %201 = vector.extract_strided_slice %191 {offsets = [0, 32], sizes = [8, 32], strides = [1, 1]} : vector<8x128xf32> to vector<8x32xf32>
    %202 = arith.addf %200, %201 : vector<8x32xf32>
    %203 = arith.negf %202 : vector<8x32xf32>
    %204 = math.exp %203 : vector<8x32xf32>
    %cst_46 = arith.constant 1.000000e+00 : f32
    %205 = vector.broadcast %cst_46 : f32 to vector<8x32xf32>
    %206 = arith.addf %205, %204 : vector<8x32xf32>
    %207 = arith.divf %205, %206 : vector<8x32xf32>
    %208 = vector.extract_strided_slice %190 {offsets = [0, 64], sizes = [8, 32], strides = [1, 1]} : vector<8x128xf32> to vector<8x32xf32>
    %209 = vector.extract_strided_slice %191 {offsets = [0, 64], sizes = [8, 32], strides = [1, 1]} : vector<8x128xf32> to vector<8x32xf32>
    %210 = vector.broadcast %8 : vector<1x32xf32> to vector<8x32xf32>
    %211 = arith.addf %209, %210 : vector<8x32xf32>
    %212 = arith.mulf %199, %211 : vector<8x32xf32>
    %213 = arith.addf %208, %212 : vector<8x32xf32>
    %214 = math.tanh %213 : vector<8x32xf32>
    %cst_47 = arith.constant 1.000000e+00 : f32
    %215 = vector.broadcast %cst_47 : f32 to vector<8x32xf32>
    %216 = arith.subf %215, %207 : vector<8x32xf32>
    %217 = arith.mulf %216, %214 : vector<8x32xf32>
    %218 = arith.mulf %207, %189 : vector<8x32xf32>
    %219 = arith.addf %217, %218 : vector<8x32xf32>
    %c56 = arith.constant 56 : index
    %c0_48 = arith.constant 0 : index
    %220 = vector.load %arg8[%c56, %c0_48] : memref<64x128xf32, #tpu.memory_space<vmem>>, vector<8x128xf32>
    %cst_49 = arith.constant dense<0.000000e+00> : vector<8x128xf32>
    %221 = tpu.matmul %219, %7, %cst_49 {dimension_numbers = #tpu.dot_dimension_numbers<[1], [0], [0], [1], [0, 0, 1, 1], [], []>} : vector<8x32xf32>, vector<32x128xf32>, vector<8x128xf32> -> vector<8x128xf32>
    %222 = vector.extract_strided_slice %220 {offsets = [0, 0], sizes = [8, 32], strides = [1, 1]} : vector<8x128xf32> to vector<8x32xf32>
    %223 = vector.extract_strided_slice %221 {offsets = [0, 0], sizes = [8, 32], strides = [1, 1]} : vector<8x128xf32> to vector<8x32xf32>
    %224 = arith.addf %222, %223 : vector<8x32xf32>
    %225 = arith.negf %224 : vector<8x32xf32>
    %226 = math.exp %225 : vector<8x32xf32>
    %cst_50 = arith.constant 1.000000e+00 : f32
    %227 = vector.broadcast %cst_50 : f32 to vector<8x32xf32>
    %228 = arith.addf %227, %226 : vector<8x32xf32>
    %229 = arith.divf %227, %228 : vector<8x32xf32>
    %230 = vector.extract_strided_slice %220 {offsets = [0, 32], sizes = [8, 32], strides = [1, 1]} : vector<8x128xf32> to vector<8x32xf32>
    %231 = vector.extract_strided_slice %221 {offsets = [0, 32], sizes = [8, 32], strides = [1, 1]} : vector<8x128xf32> to vector<8x32xf32>
    %232 = arith.addf %230, %231 : vector<8x32xf32>
    %233 = arith.negf %232 : vector<8x32xf32>
    %234 = math.exp %233 : vector<8x32xf32>
    %cst_51 = arith.constant 1.000000e+00 : f32
    %235 = vector.broadcast %cst_51 : f32 to vector<8x32xf32>
    %236 = arith.addf %235, %234 : vector<8x32xf32>
    %237 = arith.divf %235, %236 : vector<8x32xf32>
    %238 = vector.extract_strided_slice %220 {offsets = [0, 64], sizes = [8, 32], strides = [1, 1]} : vector<8x128xf32> to vector<8x32xf32>
    %239 = vector.extract_strided_slice %221 {offsets = [0, 64], sizes = [8, 32], strides = [1, 1]} : vector<8x128xf32> to vector<8x32xf32>
    %240 = vector.broadcast %8 : vector<1x32xf32> to vector<8x32xf32>
    %241 = arith.addf %239, %240 : vector<8x32xf32>
    %242 = arith.mulf %229, %241 : vector<8x32xf32>
    %243 = arith.addf %238, %242 : vector<8x32xf32>
    %244 = math.tanh %243 : vector<8x32xf32>
    %cst_52 = arith.constant 1.000000e+00 : f32
    %245 = vector.broadcast %cst_52 : f32 to vector<8x32xf32>
    %246 = arith.subf %245, %237 : vector<8x32xf32>
    %247 = arith.mulf %246, %244 : vector<8x32xf32>
    %248 = arith.mulf %237, %219 : vector<8x32xf32>
    %249 = arith.addf %247, %248 : vector<8x32xf32>
    %c0_53 = arith.constant 0 : index
    %c0_54 = arith.constant 0 : index
    %250 = vector.load %arg5[%c0_53, %c0_54] : memref<32x128xf32, #tpu.memory_space<vmem>>, vector<32x128xf32>
    %cst_55 = arith.constant dense<0.000000e+00> : vector<8x128xf32>
    %251 = tpu.matmul %249, %250, %cst_55 {dimension_numbers = #tpu.dot_dimension_numbers<[1], [0], [0], [1], [0, 0, 1, 1], [], []>} : vector<8x32xf32>, vector<32x128xf32>, vector<8x128xf32> -> vector<8x128xf32>
    %c0_56 = arith.constant 0 : index
    %c0_57 = arith.constant 0 : index
    %252 = vector.load %arg6[%c0_56, %c0_57] : memref<1x128xf32, #tpu.memory_space<vmem>>, vector<1x128xf32>
    %253 = vector.broadcast %252 : vector<1x128xf32> to vector<8x128xf32>
    %254 = arith.addf %251, %253 : vector<8x128xf32>
    %cst_58 = arith.constant dense<0xFF800000> : vector<8xf32>
    %255 = vector.multi_reduction <maximumf>, %254, %cst_58 [1] : vector<8x128xf32> to vector<8xf32>
    %256 = vector.shape_cast %255 : vector<8xf32> to vector<8x1xf32>
    %257 = vector.broadcast %256 : vector<8x1xf32> to vector<8x128xf32>
    %258 = arith.subf %254, %257 : vector<8x128xf32>
    %259 = math.exp %258 : vector<8x128xf32>
    %cst_59 = arith.constant dense<0.000000e+00> : vector<8xf32>
    %260 = vector.multi_reduction <add>, %259, %cst_59 [1] : vector<8x128xf32> to vector<8xf32>
    %261 = vector.shape_cast %260 : vector<8xf32> to vector<8x1xf32>
    %262 = tpu.reciprocal %261 {approx = true} : vector<8x1xf32> -> vector<8x1xf32>
    %263 = vector.broadcast %262 : vector<8x1xf32> to vector<8x128xf32>
    %264 = arith.mulf %259, %263 : vector<8x128xf32>
    %c0_60 = arith.constant 0 : index
    %c0_61 = arith.constant 0 : index
    %265 = vector.load %arg7[%c0_60, %c0_61] : memref<8x128xf32, #tpu.memory_space<vmem>>, vector<8x128xf32>
    tpu.vector_store %arg7[%c0_60, %c0_61], %264 {strides = array<i32>} : memref<8x128xf32, #tpu.memory_space<vmem>>, vector<8x128xf32>,
    return
  }
}

</mosaic_0001>

<bundles_post_ra>
// kernel: vsn_forward.1
= control target key start
LH: loop header
LB: loop body
LE: loop exit
PB: predicated region body
PF: predicated region fallthrough
CT: control target
= control target key end

     0   :  { %v1377_v0 = vmov 0.0   ;;  %vm1378_vm0 = vmmov 0   ;;  %vm45_vm1 = vcmask 261120   ;;  %s1379_s21 = smov 64   ;;  %s1669_s1 = inlined_call_operand.vmem [shape: f32[32,128], index: 1, kind: input, shape index: {}]   ;;  %s1670_s3 = inlined_call_operand.vmem [shape: f32[32,128], index: 3, kind: input, shape index: {}]   ;;  %s1671_s0 = inlined_call_operand.vmem [shape: f32[64,32], index: 0, kind: input, shape index: {}]   ;;  %s1672_s4 = inlined_call_operand.vmem [shape: f32[1,32], index: 4, kind: input, shape index: {}]   ;;  %s1673_s2 = inlined_call_operand.vmem [shape: f32[1,128], index: 2, kind: input, shape index: {}]   ;;  %s1674_s5 = inlined_call_operand.vmem [shape: f32[32,128], index: 5, kind: input, shape index: {}]   ;;  %s1675_s6 = inlined_call_operand.vmem [shape: f32[1,128], index: 6, kind: input, shape index: {}]   ;;  %s1676_s7 = inlined_call_operand.vmem [shape: f32[8,128], index: 7, kind: output, shape index: {}]  }
   0x1   :  { %1222 = vmatprep.subr.mxu1 %v1377_v0  ;;  %v37_v1 = vld [vmem:[%s1669_s1 + $0x18] sm:$0xff]  ;;  %v36_v3 = vld [vmem:[%s1669_s1 + $0x10] sm:$0xff]  ;;  %1230 = vmatprep.mubr.msk.f32.mxu1 %vm1378_vm0, %v1377_v0  ;;  %v35_v5 = vld [vmem:[%s1669_s1 + $0x8] sm:$0xff] }
   0x2   :  { %v1428_v2 = vld [vmem:[%s1670_s3 + $0x18] sm:$0xff]  ;;  %1202 = vmatprep.subr.mxu0 %v37_v1  ;;  %v1439_v4 = vld [vmem:[%s1670_s3 + $0x10] sm:$0xff]  ;;  %v1448_v6 = vld [vmem:[%s1670_s3 + $0x8] sm:$0xff] }
   0x3   :  { %1223 = vmatpush3.msra.mxu1 %v1428_v2  ;;  %1203 = vmatpush3.msra.mxu0 %v37_v1  ;;  %v34_v7 = vld [vmem:[%s1669_s1] sm:$0xff]  ;;  %v27_v10 = vld [vmem:[%s1671_s0 + $0x8] sm:$0xff]  ;;  %v28_v49 = vld [vmem:[%s1671_s0 + $0x10] sm:$0xff] }
   0x4   :  { %1224 = vmatprep.subr.mxu1 %v1377_v0  ;;  %1204 = vmatprep.subr.mxu0 %v36_v3  ;;  %v1458_v8 = vld [vmem:[%s1670_s3] sm:$0xff]  ;;  %v29_v50 = vld [vmem:[%s1671_s0 + $0x18] sm:$0xff]  ;;  %v31_v52 = vld [vmem:[%s1671_s0 + $0x28] sm:$0xff] }
   0x5   :  { %1225 = vmatpush3.msra.mxu1 %v1439_v4  ;;  %1205 = vmatpush3.msra.mxu0 %v36_v3  ;;  %v26_v9 = vld [vmem:[%s1671_s0] sm:$0xff]  ;;  %v32_v53 = vld [vmem:[%s1671_s0 + $0x30] sm:$0xff]  ;;  %v33_v54 = vld [vmem:[%s1671_s0 + $0x38] sm:$0xff] }
   0x6   :  { %1226 = vmatprep.subr.mxu1 %v1377_v0  ;;  %1206 = vmatprep.subr.mxu0 %v35_v5  ;;  %v1128_v11 = vld [vmem:[%s1672_s4] ss:$0 sm:$0xff] }
   0x7   :  { %1227 = vmatpush3.msra.mxu1 %v1448_v6  ;;  %1207 = vmatpush3.msra.mxu0 %v35_v5  ;;  %v1503_v17 = vld [vmem:[%s1673_s2] ss:$0 sm:$0xff]  ;;  %s1380_s2 = smov 96  }
   0x8   :  { %1228 = vmatprep.subr.mxu1 %v1377_v0  ;;  %1208 = vmatprep.subr.mxu0 %v34_v7  ;;  %v30_v51 = vld [vmem:[%s1671_s0 + $0x20] sm:$0xff] }
   0x9   :  { %1229 = vmatpush3.msra.mxu1 %v1458_v8  ;;  %1209 = vmatpush3.msra.mxu0 %v34_v7 }
   0xa   :  { %1210 = vmatprep.mubr.msk.f32.mxu0 %vm45_vm1, %v26_v9  ;;  %1231 = vmatmul.mubr.f32.vlgmr.msra.gmra.mxu1 %v1377_v0 }
   0xb   :  { %1211 = vmatmul.mubr.msk.f32.vlgmr.msra.gmra.mxu0 %vm45_vm1, %v27_v10  ;;  %274 = vrot.lane.b32.xlu0 %v1128_v11, %s1379_s21 }
   0xc   :  { %1233 = vmatprep.subr.mxu1 %v1377_v0  ;;  %1241 = vmatprep.mubr.msk.f32.mxu1 %vm1378_vm0, %v1377_v0 }
   0xd   :  { %1234 = vmatpush3.msra.mxu1 %v1428_v2  ;;  %1244 = vmatprep.subr.mxu0 %v1377_v0 }
   0xe   :  { %1235 = vmatprep.subr.mxu1 %v1377_v0  ;;  %1245 = vmatpush3.msra.mxu0 %v1428_v2 }
   0xf   :  { %1236 = vmatpush3.msra.mxu1 %v1439_v4  ;;  %1246 = vmatprep.subr.mxu0 %v1377_v0 }
  0x10   :  { %1237 = vmatprep.subr.mxu1 %v1377_v0  ;;  %1247 = vmatpush3.msra.mxu0 %v1439_v4 }
  0x11   :  { %1238 = vmatpush3.msra.mxu1 %v1448_v6  ;;  %1248 = vmatprep.subr.mxu0 %v1377_v0 }
  0x12   :  { %1239 = vmatprep.subr.mxu1 %v1377_v0  ;;  %1249 = vmatpush3.msra.mxu0 %v1448_v6 }
  0x13   :  { %1240 = vmatpush3.msra.mxu1 %v1458_v8  ;;  %1250 = vmatprep.subr.mxu0 %v1377_v0 }
  0x14   :  { %1255 = vmatprep.subr.mxu1 %v1377_v0  ;;  %1251 = vmatpush3.msra.mxu0 %v1458_v8 }
  0x15   :  { %1266 = vmatprep.subr.mxu0 %v1377_v0  ;;  %1213 = vmatprep.mubr.msk.f32.mxu0 %vm45_vm1, %v28_v49 }
  0x16   :  { %1214 = vmatmul.mubr.msk.f32.gmra.mxu0 %vm45_vm1, %v29_v50 }
  0x17   :  { %1216 = vmatprep.mubr.msk.f32.mxu0 %vm45_vm1, %v30_v51 }
  0x1a   :  { %1217 = vmatmul.mubr.msk.f32.gmra.mxu0 %vm45_vm1, %v31_v52 }
  0x1b   :  { %1219 = vmatprep.mubr.msk.f32.mxu0 %vm45_vm1, %v32_v53 }
  0x1e   :  { %1220 = vmatmul.mubr.msk.f32.gmra.mxu0 %vm45_vm1, %v33_v54 }
  0x1f   :  { %1252 = vmatprep.mubr.msk.f32.mxu0 %vm1378_vm0, %v1377_v0 }
  0x7d   :  { %v1496_v12 = vpop.permute.xlu0 %274 }
  0xca   :  { %v258_v13 = vpop.f32.mrf.mxu1 }
  0xcb   :  { %v277_v14 = vadd.f32 %v1496_v12, %v258_v13  ;;  %v1212_v16 = vpop.f32.mrf.mxu0 }
  0xcc   :  { %v1232_v15 = vpop.f32.mrf.mxu1  ;;  %v142_v39 = vadd.f32 %v1212_v16, %v1503_v17 }
  0xcd   :  { %279 = vrot.lane.b32.xlu0 %v277_v14, %s1379_s21  ;;  %v136_v18 = vpop.f32.mrf.mxu0 }
  0xce   :  { %v137_v19 = vadd.f32 %v1503_v17, %v136_v18 }
  0xd0   :  { %v262_v20 = vadd.f32 %v258_v13, %v137_v19 }
  0xd2   :  { %v1127_v21 = vmul.f32 -1.442695, %v262_v20 }
  0xd4   :  { %1325 = vpow2.f32 %v1127_v21 }
  0xd6   :  { %v1215_v62 = vpop.f32.mrf.mxu0 }
  0xd8   :  { %v146_v63 = vpop.f32.mrf.mxu0 }
  0xd9   :  { %v147_v13 = vadd.f32 %v1503_v17, %v146_v63 }
  0xda   :  { %v1563_v1 = vpop.f32.mrf.mxu0 }
  0xdc   :  { %v1565_v3 = vpop.f32.mrf.mxu0 }
  0xdd   :  { %v157_v54 = vadd.f32 %v1503_v17, %v1565_v3 }
  0xde   :  { %v1567_v5 = vpop.f32.mrf.mxu0 }
  0xe0   :  { %v1569_v7 = vpop.f32.mrf.mxu0 }
  0xe1   :  { %v1326_v22 = vpop.eup %1325 }
  0xe2   :  { %v266_v23 = vadd.f32 1.0, %v1326_v22 }
  0xe4   :  { %1327 = vrcp.f32 %v266_v23 }
  0xf1   :  { %v1328_v24 = vpop.eup %1327 }
  0xf2   :  { %v289_v30 = vsub.f32 1.0, %v1328_v24  ;;  %v295_v32 = vmul.f32 0.0, %v1328_v24 }
 0x13f   :  { %v280_v25 = vpop.permute.xlu0 %279 }
 0x140   :  { %v282_v26 = vmul.f32 %v1328_v24, %v280_v25 }
 0x142   :  { %284 = vrot.lane.b32.xlu1 %v282_v26, %s1379_s21 }
 0x1b4   :  { %v285_v27 = vpop.permute.xlu1 %284 }
 0x1b5   :  { %v287_v28 = vadd.f32 %v285_v27, %v137_v19 }
 0x1b7   :  { %1329 = vtanh.f32 %v287_v28 }
 0x1c4   :  { %v1330_v29 = vpop.eup %1329 }
 0x1c5   :  { %291 = vrot.lane.b32.xlu1 %v1330_v29, %s1380_s2 }
 0x237   :  { %v292_v31 = vpop.permute.xlu1 %291 }
 0x238   :  { %v294_v33 = vmul.f32 %v292_v31, %v289_v30 }
 0x23a   :  { %v296_v34 = vadd.f32 %v295_v32, %v294_v33 }
 0x23c   :  { %299 = vrot.lane.b32.xlu0 %v296_v34, %s1380_s2 }
 0x2ae   :  { %v300_v35 = vpop.permute.xlu0 %299 }
 0x2af   :  { %1242 = vmatmul.mubr.msk.f32.vlgmr.msra.gmra.mxu1 %vm45_vm1, %v300_v35 }
 0x2b0   :  { %1256 = vmatpush3.msra.mxu1 %v1428_v2  ;;  %1263 = vmatprep.mubr.msk.f32.mxu1 %vm1378_vm0, %v1377_v0 }
 0x2b1   :  { %1257 = vmatprep.subr.mxu1 %v1377_v0 }
 0x2b2   :  { %1258 = vmatpush3.msra.mxu1 %v1439_v4 }
 0x2b3   :  { %1259 = vmatprep.subr.mxu1 %v1377_v0 }
 0x2b4   :  { %1260 = vmatpush3.msra.mxu1 %v1448_v6 }
 0x2b5   :  { %1261 = vmatprep.subr.mxu1 %v1377_v0 }
 0x2b6   :  { %1262 = vmatpush3.msra.mxu1 %v1458_v8 }
 0x2b7   :  { %1277 = vmatprep.subr.mxu1 %v1377_v0 }
 0x36f   :  { %v369_v36 = vpop.f32.mrf.mxu1 }
 0x370   :  { %v380_v37 = vadd.f32 %v369_v36, %v1496_v12  ;;  %v373_v40 = vadd.f32 %v369_v36, %v142_v39 }
 0x371   :  { %v1243_v38 = vpop.f32.mrf.mxu1 }
 0x372   :  { %382 = vrot.lane.b32.xlu1 %v380_v37, %s1379_s21  ;;  %v1130_v41 = vmul.f32 -1.442695, %v373_v40 }
 0x374   :  { %1331 = vpow2.f32 %v1130_v41 }
 0x381   :  { %v1332_v42 = vpop.eup %1331 }
 0x382   :  { %v377_v43 = vadd.f32 1.0, %v1332_v42 }
 0x384   :  { %1333 = vrcp.f32 %v377_v43 }
 0x391   :  { %v1334_v44 = vpop.eup %1333 }
 0x392   :  { %v392_v56 = vsub.f32 1.0, %v1334_v44  ;;  %v398_v58 = vmul.f32 %v1334_v44, %v296_v34  ;;  %v152_v34 = vadd.f32 %v1215_v62, %v1503_v17 }
 0x3e4   :  { %v383_v45 = vpop.permute.xlu1 %382 }
 0x3e5   :  { %v385_v46 = vmul.f32 %v1334_v44, %v383_v45 }
 0x3e7   :  { %387 = vrot.lane.b32.xlu0 %v385_v46, %s1379_s21 }
 0x459   :  { %v388_v47 = vpop.permute.xlu0 %387 }
 0x45a   :  { %v390_v48 = vadd.f32 %v388_v47, %v142_v39 }
 0x45c   :  { %1335 = vtanh.f32 %v390_v48 }
 0x469   :  { %v1336_v55 = vpop.eup %1335 }
 0x46a   :  { %394 = vrot.lane.b32.xlu1 %v1336_v55, %s1380_s2 }
 0x4dc   :  { %v395_v57 = vpop.permute.xlu1 %394 }
 0x4dd   :  { %v397_v59 = vmul.f32 %v395_v57, %v392_v56 }
 0x4df   :  { %v399_v60 = vadd.f32 %v398_v58, %v397_v59 }
 0x4e1   :  { %402 = vrot.lane.b32.xlu0 %v399_v60, %s1380_s2 }
 0x553   :  { %v403_v61 = vpop.permute.xlu0 %402 }
 0x554   :  { %1253 = vmatmul.mubr.msk.f32.vlgmr.msra.gmra.mxu0 %vm45_vm1, %v403_v61 }
 0x555   :  { %1267 = vmatpush3.msra.mxu0 %v1428_v2  ;;  %1274 = vmatprep.mubr.msk.f32.mxu0 %vm1378_vm0, %v1377_v0 }
 0x556   :  { %1268 = vmatprep.subr.mxu0 %v1377_v0 }
 0x557   :  { %1269 = vmatpush3.msra.mxu0 %v1439_v4 }
 0x558   :  { %1270 = vmatprep.subr.mxu0 %v1377_v0 }
 0x559   :  { %1271 = vmatpush3.msra.mxu0 %v1448_v6 }
 0x55a   :  { %1272 = vmatprep.subr.mxu0 %v1377_v0 }
 0x55b   :  { %1273 = vmatpush3.msra.mxu0 %v1458_v8 }
 0x55c   :  { %1288 = vmatprep.subr.mxu0 %v1377_v0 }
 0x614   :  { %v472_v9 = vpop.f32.mrf.mxu0 }
 0x615   :  { %v483_v10 = vadd.f32 %v472_v9, %v1496_v12  ;;  %v476_v14 = vadd.f32 %v472_v9, %v147_v13 }
 0x616   :  { %v1254_v11 = vpop.f32.mrf.mxu0 }
 0x617   :  { %485 = vrot.lane.b32.xlu1 %v483_v10, %s1379_s21  ;;  %v1132_v15 = vmul.f32 -1.442695, %v476_v14 }
 0x619   :  { %1337 = vpow2.f32 %v1132_v15 }
 0x626   :  { %v1338_v16 = vpop.eup %1337 }
 0x627   :  { %v480_v18 = vadd.f32 1.0, %v1338_v16 }
 0x629   :  { %1339 = vrcp.f32 %v480_v18 }
 0x636   :  { %v1340_v19 = vpop.eup %1339 }
 0x637   :  { %v495_v25 = vsub.f32 1.0, %v1340_v19  ;;  %v501_v27 = vmul.f32 %v1340_v19, %v399_v60 }
 0x689   :  { %v486_v20 = vpop.permute.xlu1 %485 }
 0x68a   :  { %v488_v21 = vmul.f32 %v1340_v19, %v486_v20 }
 0x68c   :  { %490 = vrot.lane.b32.xlu0 %v488_v21, %s1379_s21 }
 0x6fe   :  { %v491_v22 = vpop.permute.xlu0 %490 }
 0x6ff   :  { %v493_v23 = vadd.f32 %v491_v22, %v147_v13 }
 0x701   :  { %1341 = vtanh.f32 %v493_v23 }
 0x70e   :  { %v1342_v24 = vpop.eup %1341 }
 0x70f   :  { %497 = vrot.lane.b32.xlu1 %v1342_v24, %s1380_s2 }
 0x781   :  { %v498_v26 = vpop.permute.xlu1 %497 }
 0x782   :  { %v500_v28 = vmul.f32 %v498_v26, %v495_v25 }
 0x784   :  { %v502_v29 = vadd.f32 %v501_v27, %v500_v28 }
 0x786   :  { %505 = vrot.lane.b32.xlu0 %v502_v29, %s1380_s2 }
 0x7f8   :  { %v506_v30 = vpop.permute.xlu0 %505 }
 0x7f9   :  { %1264 = vmatmul.mubr.msk.f32.vlgmr.msra.gmra.mxu1 %vm45_vm1, %v506_v30 }
 0x7fa   :  { %1278 = vmatpush3.msra.mxu1 %v1428_v2  ;;  %1285 = vmatprep.mubr.msk.f32.mxu1 %vm1378_vm0, %v1377_v0 }
 0x7fb   :  { %1279 = vmatprep.subr.mxu1 %v1377_v0 }
 0x7fc   :  { %1280 = vmatpush3.msra.mxu1 %v1439_v4 }
 0x7fd   :  { %1281 = vmatprep.subr.mxu1 %v1377_v0 }
 0x7fe   :  { %1282 = vmatpush3.msra.mxu1 %v1448_v6 }
 0x7ff   :  { %1283 = vmatprep.subr.mxu1 %v1377_v0 }
 0x800   :  { %1284 = vmatpush3.msra.mxu1 %v1458_v8 }
 0x801   :  { %1299 = vmatprep.subr.mxu1 %v1377_v0 }
 0x8b9   :  { %v575_v31 = vpop.f32.mrf.mxu1 }
 0x8ba   :  { %v586_v32 = vadd.f32 %v575_v31, %v1496_v12  ;;  %v579_v35 = vadd.f32 %v575_v31, %v152_v34 }
 0x8bb   :  { %v1265_v33 = vpop.f32.mrf.mxu1 }
 0x8bc   :  { %588 = vrot.lane.b32.xlu1 %v586_v32, %s1379_s21  ;;  %v1134_v36 = vmul.f32 -1.442695, %v579_v35  ;;  %v167_v35 = vadd.f32 %v1503_v17, %v1569_v7 }
 0x8be   :  { %1343 = vpow2.f32 %v1134_v36 }
 0x8cb   :  { %v1344_v37 = vpop.eup %1343 }
 0x8cc   :  { %v583_v38 = vadd.f32 1.0, %v1344_v37 }
 0x8ce   :  { %1345 = vrcp.f32 %v583_v38 }
 0x8db   :  { %v1346_v39 = vpop.eup %1345 }
 0x8dc   :  { %v598_v45 = vsub.f32 1.0, %v1346_v39  ;;  %v604_v47 = vmul.f32 %v1346_v39, %v502_v29 }
 0x92e   :  { %v589_v40 = vpop.permute.xlu1 %588 }
 0x92f   :  { %v591_v41 = vmul.f32 %v1346_v39, %v589_v40 }
 0x931   :  { %593 = vrot.lane.b32.xlu0 %v591_v41, %s1379_s21 }
 0x9a3   :  { %v594_v42 = vpop.permute.xlu0 %593 }
 0x9a4   :  { %v596_v43 = vadd.f32 %v594_v42, %v152_v34 }
 0x9a6   :  { %1347 = vtanh.f32 %v596_v43 }
 0x9b3   :  { %v1348_v44 = vpop.eup %1347 }
 0x9b4   :  { %600 = vrot.lane.b32.xlu1 %v1348_v44, %s1380_s2 }
 0xa26   :  { %v601_v46 = vpop.permute.xlu1 %600 }
 0xa27   :  { %v603_v48 = vmul.f32 %v601_v46, %v598_v45 }
 0xa29   :  { %v605_v49 = vadd.f32 %v604_v47, %v603_v48 }
 0xa2b   :  { %608 = vrot.lane.b32.xlu0 %v605_v49, %s1380_s2 }
 0xa9d   :  { %v609_v50 = vpop.permute.xlu0 %608 }
 0xa9e   :  { %1275 = vmatmul.mubr.msk.f32.vlgmr.msra.gmra.mxu0 %vm45_vm1, %v609_v50 }
 0xa9f   :  { %1289 = vmatpush3.msra.mxu0 %v1428_v2  ;;  %1296 = vmatprep.mubr.msk.f32.mxu0 %vm1378_vm0, %v1377_v0 }
 0xaa0   :  { %1290 = vmatprep.subr.mxu0 %v1377_v0 }
 0xaa1   :  { %1291 = vmatpush3.msra.mxu0 %v1439_v4 }
 0xaa2   :  { %1292 = vmatprep.subr.mxu0 %v1377_v0 }
 0xaa3   :  { %1293 = vmatpush3.msra.mxu0 %v1448_v6 }
 0xaa4   :  { %1294 = vmatprep.subr.mxu0 %v1377_v0 }
 0xaa5   :  { %1295 = vmatpush3.msra.mxu0 %v1458_v8 }
 0xaa6   :  { %1310 = vmatprep.subr.mxu0 %v1377_v0 }
 0xb5e   :  { %v678_v51 = vpop.f32.mrf.mxu0 }
 0xb5f   :  { %v689_v52 = vadd.f32 %v678_v51, %v1496_v12  ;;  %v682_v55 = vadd.f32 %v678_v51, %v157_v54 }
 0xb60   :  { %v1276_v53 = vpop.f32.mrf.mxu0 }
 0xb61   :  { %691 = vrot.lane.b32.xlu1 %v689_v52, %s1379_s21  ;;  %v1136_v56 = vmul.f32 -1.442695, %v682_v55 }
 0xb63   :  { %1349 = vpow2.f32 %v1136_v56 }
 0xb70   :  { %v1350_v57 = vpop.eup %1349 }
 0xb71   :  { %v686_v58 = vadd.f32 1.0, %v1350_v57 }
 0xb73   :  { %1351 = vrcp.f32 %v686_v58 }
 0xb80   :  { %v1352_v59 = vpop.eup %1351 }
 0xb81   :  { %v701_v10 = vsub.f32 1.0, %v1352_v59  ;;  %v707_v3 = vmul.f32 %v1352_v59, %v605_v49 }
 0xbd3   :  { %v692_v60 = vpop.permute.xlu1 %691 }
 0xbd4   :  { %v694_v61 = vmul.f32 %v1352_v59, %v692_v60 }
 0xbd6   :  { %696 = vrot.lane.b32.xlu0 %v694_v61, %s1379_s21 }
 0xc48   :  { %v697_v62 = vpop.permute.xlu0 %696 }
 0xc49   :  { %v699_v63 = vadd.f32 %v697_v62, %v157_v54  ;;  %v172_v54 = vadd.f32 %v1567_v5, %v1503_v17  ;;  %v1019_v5 = vld [vmem:[%s1674_s5 + $0x8] sm:$0xff] }
 0xc4b   :  { %1353 = vtanh.f32 %v699_v63 }
 0xc58   :  { %v1354_v9 = vpop.eup %1353 }
 0xc59   :  { %703 = vrot.lane.b32.xlu1 %v1354_v9, %s1380_s2  ;;  %v1018_v9 = vld [vmem:[%s1674_s5] sm:$0xff] }
 0xccb   :  { %v704_v11 = vpop.permute.xlu1 %703 }
 0xccc   :  { %v706_v13 = vmul.f32 %v704_v11, %v701_v10 }
 0xcce   :  { %v708_v14 = vadd.f32 %v707_v3, %v706_v13 }
 0xcd0   :  { %711 = vrot.lane.b32.xlu0 %v708_v14, %s1380_s2 }
 0xd42   :  { %v712_v15 = vpop.permute.xlu0 %711 }
 0xd43   :  { %1286 = vmatmul.mubr.msk.f32.vlgmr.msra.gmra.mxu1 %vm45_vm1, %v712_v15 }
 0xd44   :  { %1300 = vmatpush3.msra.mxu1 %v1428_v2  ;;  %1307 = vmatprep.mubr.msk.f32.mxu1 %vm1378_vm0, %v1377_v0  ;;  %v162_v2 = vadd.f32 %v1563_v1, %v1503_v17  ;;  %v1020_v17 = vld [vmem:[%s1674_s5 + $0x10] sm:$0xff] }
 0xd45   :  { %1301 = vmatprep.subr.mxu1 %v1377_v0 }
 0xd46   :  { %1302 = vmatpush3.msra.mxu1 %v1439_v4 }
 0xd47   :  { %1303 = vmatprep.subr.mxu1 %v1377_v0 }
 0xd48   :  { %1304 = vmatpush3.msra.mxu1 %v1448_v6 }
 0xd49   :  { %1305 = vmatprep.subr.mxu1 %v1377_v0 }
 0xd4a   :  { %1306 = vmatpush3.msra.mxu1 %v1458_v8 }
 0xe03   :  { %v781_v16 = vpop.f32.mrf.mxu1 }
 0xe04   :  { %v792_v18 = vadd.f32 %v781_v16, %v1496_v12  ;;  %v785_v20 = vadd.f32 %v781_v16, %v162_v2 }
 0xe05   :  { %v1287_v19 = vpop.f32.mrf.mxu1 }
 0xe06   :  { %794 = vrot.lane.b32.xlu1 %v792_v18, %s1379_s21  ;;  %v1138_v21 = vmul.f32 -1.442695, %v785_v20  ;;  %v1143_v18 = vld [vmem:[%s1675_s6] ss:$0 sm:$0xff] }
 0xe08   :  { %1355 = vpow2.f32 %v1138_v21 }
 0xe15   :  { %v1356_v4 = vpop.eup %1355 }
 0xe16   :  { %v789_v22 = vadd.f32 1.0, %v1356_v4 }
 0xe18   :  { %1357 = vrcp.f32 %v789_v22 }
 0xe25   :  { %v1358_v6 = vpop.eup %1357 }
 0xe26   :  { %v804_v27 = vsub.f32 1.0, %v1358_v6  ;;  %v810_v1 = vmul.f32 %v1358_v6, %v708_v14 }
 0xe78   :  { %v795_v23 = vpop.permute.xlu1 %794 }
 0xe79   :  { %v797_v24 = vmul.f32 %v1358_v6, %v795_v23 }
 0xe7b   :  { %799 = vrot.lane.b32.xlu0 %v797_v24, %s1379_s21 }
 0xeed   :  { %v800_v8 = vpop.permute.xlu0 %799 }
 0xeee   :  { %v802_v25 = vadd.f32 %v800_v8, %v162_v2 }
 0xef0   :  { %1359 = vtanh.f32 %v802_v25 }
 0xefd   :  { %v1360_v26 = vpop.eup %1359 }
 0xefe   :  { %806 = vrot.lane.b32.xlu1 %v1360_v26, %s1380_s2 }
 0xf70   :  { %v807_v28 = vpop.permute.xlu1 %806 }
 0xf71   :  { %v809_v29 = vmul.f32 %v807_v28, %v804_v27 }
 0xf73   :  { %v811_v30 = vadd.f32 %v810_v1, %v809_v29 }
 0xf75   :  { %814 = vrot.lane.b32.xlu0 %v811_v30, %s1380_s2 }
 0xfe7   :  { %v815_v31 = vpop.permute.xlu0 %814 }
 0xfe8   :  { %1297 = vmatmul.mubr.msk.f32.vlgmr.msra.gmra.mxu0 %vm45_vm1, %v815_v31 }
 0xfe9   :  { %1318 = vmatprep.mubr.msk.f32.mxu0 %vm1378_vm0, %v1377_v0 }
0x10a8   :  { %v884_v32 = vpop.f32.mrf.mxu0 }
0x10a9   :  { %v895_v33 = vadd.f32 %v884_v32, %v1496_v12  ;;  %v888_v36 = vadd.f32 %v884_v32, %v167_v35 }
0x10aa   :  { %v1298_v34 = vpop.f32.mrf.mxu0 }
0x10ab   :  { %897 = vrot.lane.b32.xlu1 %v895_v33, %s1379_s21  ;;  %v1140_v37 = vmul.f32 -1.442695, %v888_v36 }
0x10ad   :  { %1361 = vpow2.f32 %v1140_v37 }
0x10ba   :  { %v1362_v38 = vpop.eup %1361 }
0x10bb   :  { %v892_v39 = vadd.f32 1.0, %v1362_v38 }
0x10bd   :  { %1363 = vrcp.f32 %v892_v39 }
0x10ca   :  { %v1364_v40 = vpop.eup %1363 }
0x10cb   :  { %v907_v46 = vsub.f32 1.0, %v1364_v40  ;;  %v913_v7 = vmul.f32 %v1364_v40, %v811_v30 }
0x111d   :  { %v898_v41 = vpop.permute.xlu1 %897 }
0x111e   :  { %v900_v42 = vmul.f32 %v1364_v40, %v898_v41 }
0x1120   :  { %902 = vrot.lane.b32.xlu0 %v900_v42, %s1379_s21 }
0x1192   :  { %v903_v43 = vpop.permute.xlu0 %902 }
0x1193   :  { %v905_v44 = vadd.f32 %v903_v43, %v167_v35 }
0x1195   :  { %1365 = vtanh.f32 %v905_v44 }
0x11a2   :  { %v1366_v45 = vpop.eup %1365 }
0x11a3   :  { %909 = vrot.lane.b32.xlu1 %v1366_v45, %s1380_s2 }
0x1215   :  { %v910_v47 = vpop.permute.xlu1 %909 }
0x1216   :  { %v912_v48 = vmul.f32 %v910_v47, %v907_v46 }
0x1218   :  { %v914_v49 = vadd.f32 %v913_v7, %v912_v48 }
0x121a   :  { %917 = vrot.lane.b32.xlu0 %v914_v49, %s1380_s2 }
0x128c   :  { %v918_v50 = vpop.permute.xlu0 %917 }
0x128d   :  { %1308 = vmatmul.mubr.msk.f32.vlgmr.msra.gmra.mxu1 %vm45_vm1, %v918_v50 }
0x134d   :  { %v987_v51 = vpop.f32.mrf.mxu1 }
0x134e   :  { %v998_v52 = vadd.f32 %v987_v51, %v1496_v12  ;;  %v991_v55 = vadd.f32 %v987_v51, %v172_v54  ;;  %v1021_v12 = vld [vmem:[%s1674_s5 + $0x18] sm:$0xff] }
0x134f   :  { %v1309_v53 = vpop.f32.mrf.mxu1  ;;  %1311 = vmatpush3.msra.mxu0 %v1021_v12 }
0x1350   :  { %1000 = vrot.lane.b32.xlu1 %v998_v52, %s1379_s21  ;;  %v1142_v56 = vmul.f32 -1.442695, %v991_v55  ;;  %1312 = vmatprep.subr.mxu0 %v1377_v0 }
0x1351   :  { %1313 = vmatpush3.msra.mxu0 %v1020_v17 }
0x1352   :  { %1367 = vpow2.f32 %v1142_v56  ;;  %1314 = vmatprep.subr.mxu0 %v1377_v0 }
0x1353   :  { %1315 = vmatpush3.msra.mxu0 %v1019_v5 }
0x1354   :  { %1316 = vmatprep.subr.mxu0 %v1377_v0 }
0x1355   :  { %1317 = vmatpush3.msra.mxu0 %v1018_v9 }
0x135f   :  { %v1368_v57 = vpop.eup %1367 }
0x1360   :  { %v995_v58 = vadd.f32 1.0, %v1368_v57 }
0x1362   :  { %1369 = vrcp.f32 %v995_v58 }
0x136f   :  { %v1370_v59 = vpop.eup %1369 }
0x1370   :  { %v1010_v11 = vsub.f32 1.0, %v1370_v59  ;;  %v1016_v13 = vmul.f32 %v1370_v59, %v914_v49 }
0x13c2   :  { %v1001_v60 = vpop.permute.xlu1 %1000 }
0x13c3   :  { %v1003_v61 = vmul.f32 %v1370_v59, %v1001_v60 }
0x13c5   :  { %1005 = vrot.lane.b32.xlu0 %v1003_v61, %s1379_s21 }
0x1437   :  { %v1006_v62 = vpop.permute.xlu0 %1005 }
0x1438   :  { %v1008_v63 = vadd.f32 %v1006_v62, %v172_v54 }
0x143a   :  { %1371 = vtanh.f32 %v1008_v63 }
0x1447   :  { %v1372_v10 = vpop.eup %1371 }
0x1448   :  { %1012 = vrot.lane.b32.xlu1 %v1372_v10, %s1380_s2 }
0x14ba   :  { %v1013_v3 = vpop.permute.xlu1 %1012 }
0x14bb   :  { %v1015_v14 = vmul.f32 %v1013_v3, %v1010_v11 }
0x14bd   :  { %v1017_v15 = vadd.f32 %v1016_v13, %v1015_v14 }
0x14bf   :  { %1030 = vrot.lane.b32.xlu0 %v1017_v15, %s1380_s2 }
0x1531   :  { %v1031_v16 = vpop.permute.xlu0 %1030 }
0x1532   :  { %1319 = vmatmul.mubr.msk.f32.vlgmr.msra.gmra.mxu0 %vm45_vm1, %v1031_v16 }
0x15f2   :  { %v1100_v19 = vpop.f32.mrf.mxu0 }
0x15f3   :  { %v1101_v0 = vadd.f32 %v1143_v18, %v1100_v19 }
0x15f4   :  { %v1320_v2 = vpop.f32.mrf.mxu0 }
0x15f5   :  { %1104 = vmax.xlane.f32.xlu1 %v1101_v0 }
0x167e   :  { %v1105_v20 = vpop.xlane.xlu1 %1104 }
0x167f   :  { %v1106_v21 = vsub.f32 %v1101_v0, %v1105_v20 }
0x1681   :  { %v1107_v4 = vmul.f32 1.442695, %v1106_v21 }
0x1683   :  { %1373 = vpow2.f32 %v1107_v4 }
0x1690   :  { %v1374_v22 = vpop.eup %1373 }
0x1691   :  { %1109 = vadd.xlane.f32.xlu0 %v1374_v22 }
0x171a   :  { %v1110_v6 = vpop.xlane.xlu0 %1109 }
0x171b   :  { %1375 = vrcp.f32 %v1110_v6 }
0x1728   :  { %v1376_v23 = vpop.eup %1375 }
0x1729   :  { %v1112_v24 = vmul.f32 %v1376_v23, %v1374_v22 }
0x172b   :  { %1113 = vst [vmem:[%s1676_s7] sm:$0xff] %v1112_v24 }

</bundles_post_ra>
